<compile_context>
chip_gen: v5e
topology: v5e:2x2
jax: 0.10.0
libtpu: 0.0.40
codegen_flags: <defaults>
</compile_context>

<pallas_src>
import functools
import math

import jax
import jax.numpy as jnp
from jax.experimental import pallas as pl
from jax.experimental.pallas import tpu as pltpu


# ----------------------------------------------------------------------------
# helpers
# ----------------------------------------------------------------------------
def _round_up(v, m):
    return (v + m - 1) // m * m


def _cdiv(a, b):
    return -(-a // b)


def _f32_tile_bytes(rows, cols):
    """VMEM footprint of an f32 [rows, cols] slab after (8,128) tiling."""
    return _round_up(max(rows, 1), 8) * _round_up(max(cols, 1), 128) * 4


def _pick_tile_l(l_out, batch, c_in, out_ch, ksize, stride,
                 max_tile_l=1024, vmem_budget_bytes=24 * 2**20):
    """Pick an 8-aligned output-row tile that (a) is large enough to amortize
    the ~0.35us per-grid-step overhead, (b) keeps the double-buffered working
    set inside a VMEM budget (v7x has only 64 MiB physical / 32 MiB scoped),
    and (c) keeps the grid >= 4 steps deep so v7x's two TensorCores can both
    be fed via the "parallel" batch axis."""
    tile = min(_round_up(l_out, 8), _round_up(max_tile_l, 8))

    def vmem_bytes(t):
        l_feed = (_round_up(l_out, t) - 1) * stride + ksize
        x_res = 2 * (_f32_tile_bytes(l_feed, 1) + _f32_tile_bytes(l_feed, c_in - 1))
        wgt = 2 * _f32_tile_bytes(1, out_ch) + ksize * _f32_tile_bytes(c_in - 1, out_ch)
        outs = 2 * (_f32_tile_bytes(t, 1) + _f32_tile_bytes(t, out_ch))
        return x_res + wgt + outs

    while tile > 8 and vmem_bytes(tile) > vmem_budget_bytes:
        tile = _round_up(max(tile // 2, 8), 8)
    while tile > 8 and _cdiv(l_out, tile) * batch < 4:
        tile = _round_up(max(tile // 2, 8), 8)
    return tile


# ----------------------------------------------------------------------------
# Pallas kernel: fused unfold + Lorentz patch-rescale + linear + time rebuild
# ----------------------------------------------------------------------------
def _lorentz_conv1d_kernel(xt_ref, xs_ref, w_time_ref, w_space_ref, bias_ref,
                           ot_ref, os_ref, *, ksize, stride, c, tile_l):
    t = pl.program_id(1)
    # start of this tile's receptive field in the padded input
    # (8-aligned because tile_l is a multiple of 8)
    start = pl.multiple_of(t * (tile_l * stride), 8)
    sqrt_c = jnp.float32(math.sqrt(c))

    out_ch = os_ref.shape[-1]
    acc = jnp.zeros((tile_l, out_ch), jnp.float32)
    t2 = jnp.zeros((tile_l, 1), jnp.float32)

    # Fused unfold: K shifted (strided) slices of the VMEM-resident sequence.
    for k in range(ksize):
        if stride == 1:
            idx = pl.ds(start + k, tile_l)
        else:
            idx = pl.ds(start + k, tile_l, stride=stride)
        # Lorentz time component of the window, clamped to sqrt(c)
        xt = jnp.maximum(xt_ref[0, idx, :], sqrt_c)            # (tile_l, 1)
        t2 = t2 + xt * xt
        # space part -> MXU (lane-0 aligned: time/space are separate inputs)
        xs = xs_ref[0, idx, :]                                  # (tile_l, C-1)
        acc = acc + jnp.dot(xs, w_space_ref[k],
                            preferred_element_type=jnp.float32)

    # rescaled patch time (the clamp guarantees the sqrt argument >= c > 0)
    t_resc = jnp.sqrt(t2 - jnp.float32((ksize - 1) * c))        # (tile_l, 1)
    y = acc + t_resc * w_time_ref[...] + bias_ref[...]          # (tile_l, out_ch)
    # project back onto the hyperboloid: x0 = sqrt(||x_space||^2 + c)
    y_time = jnp.sqrt(jnp.sum(y * y, axis=-1, keepdims=True) + jnp.float32(c))

    # two separate stores (no in-kernel concat / lane relayout)
    os_ref[0, :, :] = y.astype(os_ref.dtype)
    ot_ref[0, :, :] = y_time.astype(ot_ref.dtype)


def lorentz_conv1d_pallas(x, weight, bias, *, c, kernel_size, stride=1,
                          padding=0, max_tile_l=1024):
    """x: [B, L, C_in] (channel 0 = time). weight: [out_ch, (C_in-1)*K + 1].
    bias: [out_ch]. Returns [B, L_out, out_ch + 1]."""
    B, L, C = x.shape
    K = int(kernel_size)
    out_ch = weight.shape[0]
    assert weight.shape[1] == (C - 1) * K + 1

    L_pad = L + 2 * padding
    L_out = (L_pad - K) // stride + 1
    assert L_out > 0

    tile_l = _pick_tile_l(L_out, B, C, out_ch, K, stride, max_tile_l)
    n_tiles = _cdiv(L_out, tile_l)
    L_out_p = n_tiles * tile_l
    # input rows needed to compute L_out_p (possibly padded) output rows;
    # padded rows read zeros -> time clamps to sqrt(c) -> no NaNs, trimmed later
    L_feed = max(L_pad, (L_out_p - 1) * stride + K)

    xp = jnp.pad(x.astype(jnp.float32),
                 ((0, 0), (padding, L_feed - L - padding), (0, 0)))
    x_time = xp[..., 0:1]            # [B, L_feed, 1]
    x_space = xp[..., 1:]            # [B, L_feed, C-1]

    # Weight layout for the fused unfold: w_space[k, ch, o] multiplies input
    # channel (ch+1) at kernel offset k  <->  reference column 1 + ch*K + k.
    Wt = weight.astype(jnp.float32).T                        # [lin, out_ch]
    w_time = Wt[0:1]                                         # [1, out_ch]
    w_space = Wt[1:].reshape(C - 1, K, out_ch).transpose(1, 0, 2)  # [K, C-1, out_ch]
    bias2 = bias.astype(jnp.float32).reshape(1, out_ch)

    kernel = functools.partial(_lorentz_conv1d_kernel, ksize=K,
                               stride=int(stride), c=float(c), tile_l=tile_l)

    # TODO(synk): for very long sequences the per-batch-resident x block should
    # be replaced by halo-tiled manual DMA (P4); full residency is fine here.
    out_time, out_space = pl.pallas_call(
        kernel,
        out_shape=(
            jax.ShapeDtypeStruct((B, L_out_p, 1), x.dtype),
            jax.ShapeDtypeStruct((B, L_out_p, out_ch), x.dtype),
        ),
        grid_spec=pltpu.PrefetchScalarGridSpec(
            num_scalar_prefetch=0,
            grid=(B, n_tiles),
            in_specs=[
                # whole padded sequence stays resident across the length tiles
                pl.BlockSpec((1, L_feed, 1), lambda b, t: (b, 0, 0)),
                pl.BlockSpec((1, L_feed, C - 1), lambda b, t: (b, 0, 0)),
                pl.BlockSpec((1, out_ch), lambda b, t: (0, 0)),
                pl.BlockSpec((K, C - 1, out_ch), lambda b, t: (0, 0, 0)),
                pl.BlockSpec((1, out_ch), lambda b, t: (0, 0)),
            ],
            out_specs=[
                pl.BlockSpec((1, tile_l, 1), lambda b, t: (b, t, 0)),
                pl.BlockSpec((1, tile_l, out_ch), lambda b, t: (b, t, 0)),
            ],
        ),
        compiler_params=pltpu.CompilerParams(
            dimension_semantics=("parallel", "arbitrary"),
            vmem_limit_bytes=32 * 1024 * 1024,
        ),
    )(x_time, x_space, w_time, w_space, bias2)

    out = jnp.concatenate([out_time[:, :L_out, :], out_space[:, :L_out, :]],
                          axis=-1)
    return out


# ----------------------------------------------------------------------------
# Pure-JAX reference (mirrors the PyTorch forward line-by-line)
# ----------------------------------------------------------------------------
def lorentz_conv1d_reference(x, weight, bias, *, c, kernel_size, stride,
                             padding):
    B, L, C = x.shape
    K = kernel_size
    xp = jnp.pad(x, ((0, 0), (padding, padding), (0, 0)))
    xp = xp.at[..., 0].set(jnp.maximum(xp[..., 0], jnp.sqrt(jnp.float32(c))))
    L_pad = L + 2 * padding
    L_out = (L_pad - K) // stride + 1
    # torch.Tensor.unfold(1, K, stride) -> [B, L_out, C, K]
    patches = jnp.stack([xp[:, i * stride:i * stride + K, :]
                         for i in range(L_out)], axis=1)        # [B,L_out,K,C]
    patches = patches.transpose(0, 1, 3, 2)                     # [B,L_out,C,K]
    pt = patches[:, :, 0:1, :]
    ptr = jnp.sqrt(jnp.sum(pt ** 2, axis=(-2, -1)) - (K - 1) * c)
    ptr = ptr.reshape(B, L_out, 1)
    ps = patches[:, :, 1:, :].reshape(B, L_out, (C - 1) * K)
    pre = jnp.concatenate([ptr, ps], axis=-1)
    y = pre @ weight.T + bias
    yt = jnp.sqrt(jnp.sum(y ** 2, axis=-1, keepdims=True) + c)
    # TODO(synk): LorentzNormalization / manifold_out rescale not implemented
    # (defaults normalize=False, manifold_out=None are used).
    return jnp.concatenate([yt, y], axis=-1)


# ----------------------------------------------------------------------------
if __name__ == "__main__":
    key = jax.random.PRNGKey(0)
    B, L, Cin = 2, 16, 4                 # in_channels=4 (incl. time)
    out_channels = 8
    kernel_size = 3
    stride = 1
    padding = 1
    c = 1.0

    k1, k2, k3 = jax.random.split(key, 3)
    # valid Lorentz points: x0 = sqrt(||x_space||^2 + c), channel 0 = time
    xs = jax.random.normal(k1, (B, L, Cin - 1), jnp.float32)
    xt = jnp.sqrt(jnp.sum(xs ** 2, axis=-1, keepdims=True) + c)
    x = jnp.concatenate([xt, xs], axis=-1)

    lin_features = (Cin - 1) * kernel_size + 1
    stdv = math.sqrt(2.0 / ((Cin - 1) * kernel_size))
    weight = jax.random.uniform(k2, (out_channels, lin_features), jnp.float32,
                                -stdv, stdv)
    bias = jax.random.uniform(k3, (out_channels,), jnp.float32, -stdv, stdv)

    out = lorentz_conv1d_pallas(x, weight, bias, c=c, kernel_size=kernel_size,
                                stride=stride, padding=padding)
    out = jax.block_until_ready(out)

    ref = lorentz_conv1d_reference(x, weight, bias, c=c,
                                   kernel_size=kernel_size, stride=stride,
                                   padding=padding)
    L_out = (L + 2 * padding - kernel_size) // stride + 1
    assert out.shape == (B, L_out, out_channels + 1), out.shape
    assert jnp.allclose(out, ref, atol=1e-4, rtol=1e-4), "mismatch vs reference"

    print("KERNEL_OK")
</pallas_src>

<mosaic_0001>
module attributes {stable_mosaic.version = 11 : i64} {
  func.func @_lorentz_conv1d_kernel(%arg0: i32, %arg1: i32, %arg2: memref<1x18x1xf32, #tpu.memory_space<vmem>>, %arg3: memref<1x18x3xf32, #tpu.memory_space<vmem>>, %arg4: memref<1x8xf32, #tpu.memory_space<vmem>>, %arg5: memref<3x3x8xf32, #tpu.memory_space<vmem>>, %arg6: memref<1x8xf32, #tpu.memory_space<vmem>>, %arg7: memref<1x8x1xf32, #tpu.memory_space<vmem>>, %arg8: memref<1x8x8xf32, #tpu.memory_space<vmem>>) attributes {dimension_semantics = [#tpu.dimension_semantics<parallel>, #tpu.dimension_semantics<arbitrary>], iteration_bounds = array<i64: 2, 2>, scalar_prefetch = 0 : i64, scratch_operands = 0 : i64, tpu.core_type = #tpu.core_type<tc>, window_params = [{transform_indices = @transform_0, window_bounds = array<i64: 1, 18, 1>}, {transform_indices = @transform_1, window_bounds = array<i64: 1, 18, 3>}, {pipeline_mode = #tpu.pipeline_mode<synchronous>, transform_indices = @transform_2, window_bounds = array<i64: 1, 8>}, {pipeline_mode = #tpu.pipeline_mode<synchronous>, transform_indices = @transform_3, window_bounds = array<i64: 3, 3, 8>}, {pipeline_mode = #tpu.pipeline_mode<synchronous>, transform_indices = @transform_4, window_bounds = array<i64: 1, 8>}, {transform_indices = @transform_5, window_bounds = array<i64: 1, 8, 1>}, {transform_indices = @transform_6, window_bounds = array<i64: 1, 8, 8>}]} {
    %c8_i32 = arith.constant 8 : i32
    %0 = arith.muli %arg1, %c8_i32 : i32
    %1 = tpu.assume_multiple %0, 8 : i32
    %cst = arith.constant 0.000000e+00 : f32
    %2 = vector.broadcast %cst : f32 to vector<8x8xf32>
    %cst_0 = arith.constant 0.000000e+00 : f32
    %3 = vector.broadcast %cst_0 : f32 to vector<8x1xf32>
    %c0_i32 = arith.constant 0 : i32
    %4 = arith.addi %1, %c0_i32 : i32
    %c0 = arith.constant 0 : index
    %5 = arith.index_cast %4 : i32 to index
    %c0_1 = arith.constant 0 : index
    %6 = vector.load %arg2[%c0, %5, %c0_1] : memref<1x18x1xf32, #tpu.memory_space<vmem>>, vector<1x8x1xf32>
    %7 = vector.shape_cast %6 : vector<1x8x1xf32> to vector<8x1xf32>
    %cst_2 = arith.constant 1.000000e+00 : f32
    %8 = vector.broadcast %cst_2 : f32 to vector<8x1xf32>
    %9 = arith.maximumf %7, %8 : vector<8x1xf32>
    %10 = arith.mulf %9, %9 : vector<8x1xf32>
    %11 = arith.addf %3, %10 : vector<8x1xf32>
    %c0_3 = arith.constant 0 : index
    %12 = arith.index_cast %4 : i32 to index
    %c0_4 = arith.constant 0 : index
    %13 = vector.load %arg3[%c0_3, %12, %c0_4] : memref<1x18x3xf32, #tpu.memory_space<vmem>>, vector<1x8x3xf32>
    %14 = vector.shape_cast %13 : vector<1x8x3xf32> to vector<8x3xf32>
    %c0_5 = arith.constant 0 : index
    %c0_6 = arith.constant 0 : index
    %c0_7 = arith.constant 0 : index
    %15 = vector.load %arg5[%c0_5, %c0_6, %c0_7] : memref<3x3x8xf32, #tpu.memory_space<vmem>>, vector<1x3x8xf32>
    %16 = vector.shape_cast %15 : vector<1x3x8xf32> to vector<3x8xf32>
    %cst_8 = arith.constant dense<0.000000e+00> : vector<8x8xf32>
    %17 = tpu.matmul %14, %16, %cst_8 {dimension_numbers = #tpu.dot_dimension_numbers<[1], [0], [0], [1], [0, 0, 1, 1], [], []>} : vector<8x3xf32>, vector<3x8xf32>, vector<8x8xf32> -> vector<8x8xf32>
    %18 = arith.addf %2, %17 : vector<8x8xf32>
    %c1_i32 = arith.constant 1 : i32
    %19 = arith.addi %1, %c1_i32 : i32
    %c0_9 = arith.constant 0 : index
    %20 = arith.index_cast %19 : i32 to index
    %c0_10 = arith.constant 0 : index
    %21 = vector.load %arg2[%c0_9, %20, %c0_10] : memref<1x18x1xf32, #tpu.memory_space<vmem>>, vector<1x8x1xf32>
    %22 = vector.shape_cast %21 : vector<1x8x1xf32> to vector<8x1xf32>
    %cst_11 = arith.constant 1.000000e+00 : f32
    %23 = vector.broadcast %cst_11 : f32 to vector<8x1xf32>
    %24 = arith.maximumf %22, %23 : vector<8x1xf32>
    %25 = arith.mulf %24, %24 : vector<8x1xf32>
    %26 = arith.addf %11, %25 : vector<8x1xf32>
    %c0_12 = arith.constant 0 : index
    %27 = arith.index_cast %19 : i32 to index
    %c0_13 = arith.constant 0 : index
    %28 = vector.load %arg3[%c0_12, %27, %c0_13] : memref<1x18x3xf32, #tpu.memory_space<vmem>>, vector<1x8x3xf32>
    %29 = vector.shape_cast %28 : vector<1x8x3xf32> to vector<8x3xf32>
    %c1 = arith.constant 1 : index
    %c0_14 = arith.constant 0 : index
    %c0_15 = arith.constant 0 : index
    %30 = vector.load %arg5[%c1, %c0_14, %c0_15] : memref<3x3x8xf32, #tpu.memory_space<vmem>>, vector<1x3x8xf32>
    %31 = vector.shape_cast %30 : vector<1x3x8xf32> to vector<3x8xf32>
    %cst_16 = arith.constant dense<0.000000e+00> : vector<8x8xf32>
    %32 = tpu.matmul %29, %31, %cst_16 {dimension_numbers = #tpu.dot_dimension_numbers<[1], [0], [0], [1], [0, 0, 1, 1], [], []>} : vector<8x3xf32>, vector<3x8xf32>, vector<8x8xf32> -> vector<8x8xf32>
    %33 = arith.addf %18, %32 : vector<8x8xf32>
    %c2_i32 = arith.constant 2 : i32
    %34 = arith.addi %1, %c2_i32 : i32
    %c0_17 = arith.constant 0 : index
    %35 = arith.index_cast %34 : i32 to index
    %c0_18 = arith.constant 0 : index
    %36 = vector.load %arg2[%c0_17, %35, %c0_18] : memref<1x18x1xf32, #tpu.memory_space<vmem>>, vector<1x8x1xf32>
    %37 = vector.shape_cast %36 : vector<1x8x1xf32> to vector<8x1xf32>
    %cst_19 = arith.constant 1.000000e+00 : f32
    %38 = vector.broadcast %cst_19 : f32 to vector<8x1xf32>
    %39 = arith.maximumf %37, %38 : vector<8x1xf32>
    %40 = arith.mulf %39, %39 : vector<8x1xf32>
    %41 = arith.addf %26, %40 : vector<8x1xf32>
    %c0_20 = arith.constant 0 : index
    %42 = arith.index_cast %34 : i32 to index
    %c0_21 = arith.constant 0 : index
    %43 = vector.load %arg3[%c0_20, %42, %c0_21] : memref<1x18x3xf32, #tpu.memory_space<vmem>>, vector<1x8x3xf32>
    %44 = vector.shape_cast %43 : vector<1x8x3xf32> to vector<8x3xf32>
    %c2 = arith.constant 2 : index
    %c0_22 = arith.constant 0 : index
    %c0_23 = arith.constant 0 : index
    %45 = vector.load %arg5[%c2, %c0_22, %c0_23] : memref<3x3x8xf32, #tpu.memory_space<vmem>>, vector<1x3x8xf32>
    %46 = vector.shape_cast %45 : vector<1x3x8xf32> to vector<3x8xf32>
    %cst_24 = arith.constant dense<0.000000e+00> : vector<8x8xf32>
    %47 = tpu.matmul %44, %46, %cst_24 {dimension_numbers = #tpu.dot_dimension_numbers<[1], [0], [0], [1], [0, 0, 1, 1], [], []>} : vector<8x3xf32>, vector<3x8xf32>, vector<8x8xf32> -> vector<8x8xf32>
    %48 = arith.addf %33, %47 : vector<8x8xf32>
    %cst_25 = arith.constant 2.000000e+00 : f32
    %49 = vector.broadcast %cst_25 : f32 to vector<8x1xf32>
    %50 = arith.subf %41, %49 : vector<8x1xf32>
    %51 = math.sqrt %50 : vector<8x1xf32>
    %c0_26 = arith.constant 0 : index
    %c0_27 = arith.constant 0 : index
    %52 = vector.load %arg4[%c0_26, %c0_27] : memref<1x8xf32, #tpu.memory_space<vmem>>, vector<1x8xf32>
    %53 = vector.broadcast %51 : vector<8x1xf32> to vector<8x8xf32>
    %54 = vector.broadcast %52 : vector<1x8xf32> to vector<8x8xf32>
    %55 = arith.mulf %53, %54 : vector<8x8xf32>
    %56 = arith.addf %48, %55 : vector<8x8xf32>
    %c0_28 = arith.constant 0 : index
    %c0_29 = arith.constant 0 : index
    %57 = vector.load %arg6[%c0_28, %c0_29] : memref<1x8xf32, #tpu.memory_space<vmem>>, vector<1x8xf32>
    %58 = vector.broadcast %57 : vector<1x8xf32> to vector<8x8xf32>
    %59 = arith.addf %56, %58 : vector<8x8xf32>
    %60 = arith.mulf %59, %59 : vector<8x8xf32>
    %cst_30 = arith.constant dense<0.000000e+00> : vector<8xf32>
    %61 = vector.multi_reduction <add>, %60, %cst_30 [1] : vector<8x8xf32> to vector<8xf32>
    %62 = vector.shape_cast %61 : vector<8xf32> to vector<8x1xf32>
    %cst_31 = arith.constant 1.000000e+00 : f32
    %63 = vector.broadcast %cst_31 : f32 to vector<8x1xf32>
    %64 = arith.addf %62, %63 : vector<8x1xf32>
    %65 = math.sqrt %64 : vector<8x1xf32>
    %c0_32 = arith.constant 0 : index
    %c0_33 = arith.constant 0 : index
    %c0_34 = arith.constant 0 : index
    %66 = vector.load %arg8[%c0_32, %c0_33, %c0_34] : memref<1x8x8xf32, #tpu.memory_space<vmem>>, vector<1x8x8xf32>
    %67 = vector.shape_cast %66 : vector<1x8x8xf32> to vector<8x8xf32>
    %68 = vector.shape_cast %59 : vector<8x8xf32> to vector<1x8x8xf32>
    tpu.vector_store %arg8[%c0_32, %c0_33, %c0_34], %68 {strides = array<i32>} : memref<1x8x8xf32, #tpu.memory_space<vmem>>, vector<1x8x8xf32>,
    %c0_35 = arith.constant 0 : index
    %c0_36 = arith.constant 0 : index
    %c0_37 = arith.constant 0 : index
    %69 = vector.load %arg7[%c0_35, %c0_36, %c0_37] : memref<1x8x1xf32, #tpu.memory_space<vmem>>, vector<1x8x1xf32>
    %70 = vector.shape_cast %69 : vector<1x8x1xf32> to vector<8x1xf32>
    %71 = vector.shape_cast %65 : vector<8x1xf32> to vector<1x8x1xf32>
    tpu.vector_store %arg7[%c0_35, %c0_36, %c0_37], %71 {strides = array<i32>} : memref<1x8x1xf32, #tpu.memory_space<vmem>>, vector<1x8x1xf32>,
    return
  }
  func.func @transform_0(%arg0: i32, %arg1: i32) -> (i32, i32, i32) {
    %c0_i32 = arith.constant 0 : i32
    %c0_i32_0 = arith.constant 0 : i32
    %c0_i32_1 = arith.constant 0 : i32
    return %arg0, %c0_i32, %c0_i32_0 : i32, i32, i32
  }
  func.func @transform_1(%arg0: i32, %arg1: i32) -> (i32, i32, i32) {
    %c0_i32 = arith.constant 0 : i32
    %c0_i32_0 = arith.constant 0 : i32
    %c0_i32_1 = arith.constant 0 : i32
    return %arg0, %c0_i32, %c0_i32_0 : i32, i32, i32
  }
  func.func @transform_2(%arg0: i32, %arg1: i32) -> (i32, i32) {
    %c0_i32 = arith.constant 0 : i32
    %c0_i32_0 = arith.constant 0 : i32
    %c0_i32_1 = arith.constant 0 : i32
    return %c0_i32, %c0_i32_0 : i32, i32
  }
  func.func @transform_3(%arg0: i32, %arg1: i32) -> (i32, i32, i32) {
    %c0_i32 = arith.constant 0 : i32
    %c0_i32_0 = arith.constant 0 : i32
    %c0_i32_1 = arith.constant 0 : i32
    %c0_i32_2 = arith.constant 0 : i32
    return %c0_i32, %c0_i32_0, %c0_i32_1 : i32, i32, i32
  }
  func.func @transform_4(%arg0: i32, %arg1: i32) -> (i32, i32) {
    %c0_i32 = arith.constant 0 : i32
    %c0_i32_0 = arith.constant 0 : i32
    %c0_i32_1 = arith.constant 0 : i32
    return %c0_i32, %c0_i32_0 : i32, i32
  }
  func.func @transform_5(%arg0: i32, %arg1: i32) -> (i32, i32, i32) {
    %c0_i32 = arith.constant 0 : i32
    %c0_i32_0 = arith.constant 0 : i32
    return %arg0, %arg1, %c0_i32 : i32, i32, i32
  }
  func.func @transform_6(%arg0: i32, %arg1: i32) -> (i32, i32, i32) {
    %c0_i32 = arith.constant 0 : i32
    %c0_i32_0 = arith.constant 0 : i32
    return %arg0, %arg1, %c0_i32 : i32, i32, i32
  }
}

</mosaic_0001>

<bundles_post_ra>
// kernel: tpu_custom_call.1
= control target key start
LH: loop header
LB: loop body
LE: loop exit
PB: predicated region body
PF: predicated region fallthrough
CT: control target
= control target key end

     0   :  { %s784_s21 = smov 0   ;;  %s786_s22 = smov 0   ;;  %s865_s0 = inlined_call_operand.vmem [shape: f32[2,18,1], index: 0, kind: input, shape index: {}]   ;;  %s866_s1 = inlined_call_operand.vmem [shape: f32[2,18,3], index: 1, kind: input, shape index: {}]   ;;  %s867_s2 = inlined_call_operand.vmem [shape: f32[1,8], index: 2, kind: input, shape index: {}]   ;;  %s868_s3 = inlined_call_operand.vmem [shape: f32[3,3,8], index: 3, kind: input, shape index: {}]   ;;  %s869_s4 = inlined_call_operand.vmem [shape: f32[1,8], index: 4, kind: input, shape index: {}]   ;;  %s870_s5 = inlined_call_operand.vmem [shape: f32[2,16,1], index: 5, kind: output, shape index: {0}]   ;;  %s871_s6 = inlined_call_operand.vmem [shape: f32[2,16,8], index: 6, kind: output, shape index: {1}]  }
   0x1   :  { %s788_s23 = smov 0   ;;  %s790_s24 = smov 0  }
   0x2   :  { %s792_s25 = smov 0  }
   0x3 LB: > { %s26_s26 = sadd.s32 1, %s738_s23  ;;  %s29_s27 = sadd.s32 1, %s742_s24  ;;  %s746_s25 = sphi %s792_s25, %s17_s25   ;;  %s742_s24 = sphi %s790_s24, %s875_s24   ;;  %s738_s23 = sphi %s788_s23, %s874_s23   ;;  %s734_s22 = sphi %s786_s22, %s873_s22   ;;  %s730_s21 = sphi %s784_s21, %s872_s21  }
   0x4   : > { %p27_p0 = scmp.ge.s32.totalorder %s26_s26, 2  ;;  %p632_p1 = scmp.ge.s32.totalorder %s746_s25, 1 }
   0x5   : > { %p241_p2 = scmp.lt.s32.totalorder %s746_s25, 5 }
   0x6   : > { %s877_s26 = smov (%p27_p0, %s26_s26), 0  ;;  %s879_s27 = smov (!%p27_p0, %s29_s27), %s742_s24 }
   0x7   : > { %p242_p3 = pnand %p632_p1, %p241_p2  ;;  %p31_p4 = scmp.ge.s32.totalorder %s879_s27, 2 }
   0x8   : > { %p287_p5 = scmp.lt.s32.totalorder (!%p242_p3), %s734_s22, 1  ;;  %s639_s11 = sshll.u32 (!%p242_p3), %s730_s21, 3 }
   0x9   : > { %s881_s27 = smov (%p31_p4, %s879_s27), 0  ;;  %245 = sbr.rel (%p242_p3) target bundleno = 316 (0x13c), region = 40 }
   0xa   : > { %p299_p6 = scmp.lt.s32.totalorder (!%p242_p3), %s730_s21, 1 }
   0xe   : > { %vm336_vm0 = vcmask 1042432   ;;  %v653_v0 = vld [vmem:[%s868_s3 + $0x8] sm:$0x7]  ;;  %v644_v1 = vld [vmem:[%s868_s3 + $0x4] sm:$0x7]  ;;  %s883_s22 = smov (!%p287_p5, %s734_s22), 1 }
   0xf   : > { %654 = vmatpush.msk.msra.mxu2 %vm336_vm0, %v653_v0  ;;  %v321_v2 = vld [vmem:[%s868_s3] sm:$0x7]  ;;  %645 = vmatpush.msk.msra.mxu0 %vm336_vm0, %v644_v1  ;;  %v748_v3 = vmov 0   ;;  %s659_s10 = smul.u32 24, %s883_s22  ;;  %vm332_vm1 = vcmask 23552   ;;  %s885_s21 = smov (!%p299_p6, %s730_s21), 1 }
  0x10   : > { %647 = vmatpush.msk.msra.mxu1 %vm336_vm0, %v321_v2  ;;  %701 = vset.pattern.permute.xlu0 %v748_v3  ;;  %s635_s20 = sshll.u32 %s883_s22, 1  ;;  %v702_v33 = vld [vmem:[%s867_s2] ss:$0 sm:$0xff]  ;;  %vm453_vm4 = vcmask 64512   ;;  %vm471_vm5 = vcmask 7168  }
  0x11   : > { %s291_s14 = scalar_lea.vmem %s865_s0, %s659_s10  ;;  %s296_s17 = scalar_lea.vmem %s866_s1, %s659_s10  ;;  %v703_v37 = vld [vmem:[%s869_s4] ss:$0 sm:$0xff] }
  0x12   : > { %s314_s18 = scalar_lea.vmem %s291_s14, %s639_s11  ;;  %s319_s19 = scalar_lea.vmem %s296_s17, %s639_s11 }
  0x13   : > { %v315_v4 = vld [vmem:[%s314_s18] sm:$0xff]  ;;  %s302_s30 = sadd.s32 %s635_s20, %s885_s21 }
  0x14   : > { %v641_v5 = vld [vmem:[%s314_s18 + $0x1] sm:$0xff]  ;;  %v316_v7 = vmax.f32 %v315_v4, 1.0  ;;  %s636_s7 = sshll.u32 %s302_s30, 3 }
  0x15   : > { %v650_v6 = vld [vmem:[%s314_s18 + $0x2] sm:$0xff]  ;;  %v325_v8 = vmax.f32 %v641_v5, 1.0  ;;  %s312_s12 = scalar_lea.vmem %s871_s6, %s636_s7  ;;  %s304_s13 = scalar_lea.vmem %s870_s5, %s636_s7 }
  0x16   : > { %v389_v9 = vmax.f32 %v650_v6, 1.0  ;;  %v652_v10 = vld [vmem:[%s319_s19 + $0x2] sm:$0xff]  ;;  %v317_v13 = vmul.f32 %v316_v7, %v316_v7 }
  0x17   : > { %v643_v11 = vld [vmem:[%s319_s19 + $0x1] sm:$0xff]  ;;  %655 = vmatmul.msk.f32.vlgmr.msra.gmra.mxu2 %vm332_vm1, %v652_v10  ;;  %v326_v14 = vmul.f32 %v325_v8, %v325_v8 }
  0x18   : > { %v320_v12 = vld [vmem:[%s319_s19] sm:$0xff]  ;;  %646 = vmatmul.msk.f32.vlgmr.msra.gmra.mxu0 %vm332_vm1, %v643_v11  ;;  %v390_v15 = vmul.f32 %v389_v9, %v389_v9 }
  0x19   : > { %648 = vmatmul.msk.f32.vlgmr.msra.gmra.mxu1 %vm332_vm1, %v320_v12  ;;  %v327_v16 = vadd.f32 %v326_v14, %v317_v13 }
  0x1b   : > { %v391_v17 = vadd.f32 %v390_v15, %v327_v16 }
  0x1d   : > { %v656_v18 = vadd.f32 -2.0, %v391_v17 }
  0x1f   : > { %704 = vrsqrt.f32 %v656_v18  ;;  %vm431_vm2 = vcmp.eq.f32.partialorder %v656_v18, inf  ;;  %v434_v25 = vand.u32 2147483648, %v656_v18  ;;  %vm433_vm3 = vcmp.eq.f32.partialorder %v656_v18, 0.0 }
  0x25   : > { %v705_v19 = vpop.eup %704 }
  0x26   : > { %v425_v20 = vmul.f32 %v705_v19, %v656_v18 }
  0x28   : > { %v426_v21 = vmul.f32 %v705_v19, %v425_v20 }
  0x2a   : > { %v427_v22 = vmul.f32 0.5, %v426_v21 }
  0x2c   : > { %v428_v23 = vsub.f32 1.5, %v427_v22 }
  0x2e   : > { %v429_v24 = vmul.f32 %v705_v19, %v428_v23 }
  0x30   : > { %v430_v26 = vmul.f32 %v656_v18, %v429_v24 }
  0x32   : > { %v432_v27 = vsel %vm431_vm2, %v656_v18, %v430_v26 }
  0x33   : > { %v435_v28 = vsel %vm433_vm3, %v434_v25, %v432_v27 }
  0x34   : > { %439 = vperm.xlu0 %701, %v435_v28  }
  0x95   : > { %v357_v29 = vpop.f32.mrf.mxu0 }
  0x96   : > { %v383_v30 = vpop.f32.mrf.mxu1 }
  0x97   : > { %v384_v31 = vadd.f32 %v383_v30, %v357_v29 }
  0x9a   : > { %v419_v32 = vpop.f32.mrf.mxu2 }
  0x9b   : > { %v422_v34 = vadd.f32 %v419_v32, %v384_v31 }
  0xa6   : > { %v440_v35 = vpop.permute.xlu0 %439 }
  0xa7   : > { %v445_v36 = vmul.f32 %v702_v33, %v440_v35 }
  0xa9   : > { %v446_v38 = vadd.f32 %v445_v36, %v422_v34 }
  0xab   : > { %v451_v39 = vadd.f32 %v703_v37, %v446_v38 }
  0xad   : > { %v452_v40 = vmul.f32 %v451_v39, %v451_v39  ;;  %470 = vst.msk [vmem:[%s312_s12] sm:$0xff] %vm453_vm4, %v451_v39 }
  0xaf   : > { %v454_v41 = vsel %vm453_vm4, %v452_v40, 0.0 }
  0xb0   : > { %455 = vadd.xlane.f32.xlu0 %v454_v41 }
 0x123   : > { %v456_v42 = vpop.xlane.xlu0 %455 }
 0x124   : > { %v457_v43 = vadd.f32 1.0, %v456_v42 }
 0x126   : > { %706 = vrsqrt.f32 %v457_v43  ;;  %vm465_vm6 = vcmp.eq.f32.partialorder %v457_v43, inf  ;;  %v468_v51 = vand.u32 2147483648, %v457_v43  ;;  %vm467_vm7 = vcmp.eq.f32.partialorder %v457_v43, 0.0 }
 0x12c   : > { %v707_v44 = vpop.eup %706 }
 0x12d   : > { %v459_v45 = vmul.f32 %v707_v44, %v457_v43 }
 0x12f   : > { %v460_v46 = vmul.f32 %v707_v44, %v459_v45 }
 0x131   : > { %v461_v47 = vmul.f32 0.5, %v460_v46 }
 0x133   : > { %v462_v48 = vsub.f32 1.5, %v461_v47 }
 0x135   : > { %v463_v49 = vmul.f32 %v707_v44, %v462_v48 }
 0x137   : > { %v464_v50 = vmul.f32 %v463_v49, %v457_v43 }
 0x139   : > { %v466_v52 = vsel %vm465_vm6, %v457_v43, %v464_v50 }
 0x13a   : > { %v469_v53 = vsel %vm467_vm7, %v468_v51, %v466_v52 }
 0x13b   : > { %472 = vst.msk [vmem:[%s304_s13] sm:$0xff] %vm471_vm5, %v469_v53 }
 0x13c PF: > { %s17_s25 = sadd.s32 1, %s746_s25   ;;  %s872_s21 = smov %s738_s23 }
 0x13d   : > { %p14_p7 = scmp.ge.s32.totalorder %s17_s25, 6   ;;  %s873_s22 = smov %s742_s24 }
 0x13e   : > { %s874_s23 = smov %s877_s26  ;;  %s875_s24 = smov %s881_s27 }
 0x13f   :  { %16 = sbr.rel (!%p14_p7) target bundleno = 3 (0x3), region = 93 }

</bundles_post_ra>
